<compile_context>
chip_gen: v5e
topology: v5e:2x2
jax: 0.10.0
libtpu: 0.0.40
codegen_flags: <defaults>
</compile_context>

<pallas_src>
import jax
import jax.numpy as jnp
from jax import lax
from jax.experimental import pallas as pl
from jax.experimental.pallas import tpu as pltpu

_LANES = 128


def _sublane_pack(dtype) -> int:
    """Minimum sublane multiple of the dtype's packed (sublane, 128) tile."""
    itemsize = jnp.dtype(dtype).itemsize
    return {4: 8, 2: 16, 1: 32}.get(itemsize, 8)


def _make_odfa_kernel(tile_rows: int, chunk_rows: int, total_rows: int,
                      needs_mask: bool):
    n_chunks = tile_rows // chunk_rows
    unroll = max(1, min(8, n_chunks))

    def kernel(a_ref, x_ref, o_ref, acc_ref):
        step = pl.program_id(0)

        @pl.when(step == 0)
        def _init():
            acc_ref[...] = jnp.zeros_like(acc_ref)

        # In-bounds rows of this tile; only consulted on a ragged last tile
        # (the mask branch below is a *static* Python choice).
        valid_rows = total_rows - step * tile_rows

        def body(i, carry):
            aa, xx, ax = carry
            off = pl.multiple_of(i * chunk_rows, chunk_rows)
            a = a_ref[pl.ds(off, chunk_rows), :].astype(jnp.float32)
            x = x_ref[pl.ds(off, chunk_rows), :].astype(jnp.float32)
            if needs_mask:
                row = off + lax.broadcasted_iota(
                    jnp.int32, (chunk_rows, _LANES), 0)
                keep = row < valid_rows
                a = jnp.where(keep, a, 0.0)
                x = jnp.where(keep, x, 0.0)
            return aa + a * a, xx + x * x, ax + a * x

        aa, xx, ax = lax.fori_loop(
            0, n_chunks, body,
            (acc_ref[0], acc_ref[1], acc_ref[2]),
            unroll=unroll)
        acc_ref[0] = aa
        acc_ref[1] = xx
        acc_ref[2] = ax

        @pl.when(step == pl.num_programs(0) - 1)
        def _finalize():
            saa = jnp.sum(acc_ref[0])        # ||a||^2
            sxx = jnp.sum(acc_ref[1])        # ||x||^2
            sax = jnp.sum(acc_ref[2])        # <a, x>
            # (u + v)^T (u + v) = 2 + 2 * <a, x> / (||a|| ||x||)
            o_ref[0, 0] = 2.0 + 2.0 * sax * lax.rsqrt(saa * sxx)

    return kernel


def odfa_loss(features_adv, features_x, *, tile_rows: int = 4096):
    """Pallas TPU implementation of ODFALoss().forward(features_adv, features_x).

    Returns a (1, 1) float32 array, matching torch.mm's output shape.
    """
    assert features_adv.shape == features_x.shape
    assert features_adv.dtype == features_x.dtype
    a = features_adv.reshape(-1)
    x = features_x.reshape(-1)
    n = a.shape[0]

    pack = _sublane_pack(a.dtype)

    # Lane-dense layout: rows of 128 lanes, minimally padded to the dtype's
    # packed sublane multiple.
    rows = pl.cdiv(n, _LANES)
    rows_p = pl.cdiv(rows, pack) * pack
    n_pad = rows_p * _LANES
    if n_pad != n:
        a = jnp.pad(a, (0, n_pad - n))
        x = jnp.pad(x, (0, n_pad - n))
    a2 = a.reshape(rows_p, _LANES)
    x2 = x.reshape(rows_p, _LANES)

    # Tile: ~2 MiB per f32 input block by default; clamp to the (packed) row
    # count so small inputs run in a single grid step with no extra padding.
    tr = max(pack, int(tile_rows))
    tr = pl.cdiv(tr, pack) * pack
    tr = min(tr, rows_p)
    grid = (pl.cdiv(rows_p, tr),)
    needs_mask = (rows_p % tr) != 0   # ragged last tile -> in-kernel row mask

    kernel = _make_odfa_kernel(tr, pack, rows_p, needs_mask)

    out = pl.pallas_call(
        kernel,
        out_shape=jax.ShapeDtypeStruct((1, 1), jnp.float32),
        grid_spec=pltpu.PrefetchScalarGridSpec(
            num_scalar_prefetch=0,
            grid=grid,
            in_specs=[
                pl.BlockSpec((tr, _LANES), lambda i: (i, 0)),
                pl.BlockSpec((tr, _LANES), lambda i: (i, 0)),
            ],
            out_specs=pl.BlockSpec(memory_space=pltpu.SMEM),
            scratch_shapes=[pltpu.VMEM((3, pack, _LANES), jnp.float32)],
        ),
        compiler_params=pltpu.CompilerParams(
            # Single carried-accumulator reduction axis -> "arbitrary".
            dimension_semantics=("arbitrary",),
            # 2 inputs x ~2 MiB x double-buffering ~ 8 MiB; 32 MiB is a safe,
            # generation-portable budget (v7x scoped default, 64 MiB phys).
            vmem_limit_bytes=32 * 1024 * 1024,
        ),
    )(a2, x2)
    return out


def _odfa_reference(features_adv, features_x):
    a = features_adv.reshape(-1).astype(jnp.float32)
    x = features_x.reshape(-1).astype(jnp.float32)
    u = a / jnp.linalg.norm(a)
    v = x / jnp.linalg.norm(x)
    s = u + v
    return jnp.dot(s, s)


if __name__ == "__main__":
    key = jax.random.PRNGKey(0)
    k1, k2, k3, k4 = jax.random.split(key, 4)

    # Case 1: f32 feature vector; tiny tile so the multi-step
    # accumulate/finalize grid path is exercised (32 rows / 8 = 4 steps).
    feat_dim = 4096
    fa = jax.random.normal(k1, (feat_dim,), dtype=jnp.float32)
    fx = jax.random.normal(k2, (feat_dim,), dtype=jnp.float32)
    out1 = jax.block_until_ready(odfa_loss(fa, fx, tile_rows=8))
    ref1 = jax.block_until_ready(_odfa_reference(fa, fx))
    assert out1.shape == (1, 1), out1.shape
    assert jnp.allclose(out1[0, 0], ref1, rtol=1e-4, atol=1e-4), (out1, ref1)

    # Case 2: non-aligned length -> intra-row zero pad + ragged last tile
    # (24 rows, tile 16 -> 2 steps, last step has only 8 valid rows).
    fa2 = jax.random.normal(k3, (3000,), dtype=jnp.float32)
    fx2 = jax.random.normal(k4, (3000,), dtype=jnp.float32)
    out2 = jax.block_until_ready(odfa_loss(fa2, fx2, tile_rows=16))
    ref2 = jax.block_until_ready(_odfa_reference(fa2, fx2))
    assert jnp.allclose(out2[0, 0], ref2, rtol=1e-4, atol=1e-4), (out2, ref2)

    # Case 3: bf16 inputs streamed at native width (pack-16 sublane rounding),
    # default tile size (clamped to the row count -> single grid step).
    out3 = jax.block_until_ready(
        odfa_loss(fa.astype(jnp.bfloat16), fx.astype(jnp.bfloat16)))
    ref3 = jax.block_until_ready(
        _odfa_reference(fa.astype(jnp.bfloat16), fx.astype(jnp.bfloat16)))
    assert jnp.allclose(out3[0, 0], ref3, rtol=2e-2, atol=2e-2), (out3, ref3)

    print("KERNEL_OK")
</pallas_src>

<mosaic_0001>
module attributes {stable_mosaic.version = 11 : i64} {
  func.func @kernel(%arg0: i32, %arg1: memref<8x128xf32, #tpu.memory_space<vmem>>, %arg2: memref<8x128xf32, #tpu.memory_space<vmem>>, %arg3: memref<1x1xf32, #tpu.memory_space<smem>>, %arg4: memref<3x8x128xf32, #tpu.memory_space<vmem>>) attributes {dimension_semantics = [#tpu.dimension_semantics<arbitrary>], iteration_bounds = array<i64: 4>, scalar_prefetch = 0 : i64, scratch_operands = 1 : i64, tpu.core_type = #tpu.core_type<tc>, window_params = [{transform_indices = @transform_0, window_bounds = array<i64: 8, 128>}, {transform_indices = @transform_1, window_bounds = array<i64: 8, 128>}, {transform_indices = @transform_2, window_bounds = array<i64: 1, 1>}]} {
    %c0_i32 = arith.constant 0 : i32
    %0 = arith.cmpi eq, %arg0, %c0_i32 : i32
    %1 = arith.extui %0 : i1 to i32
    %c0_i32_0 = arith.constant 0 : i32
    %2 = arith.cmpi ne, %1, %c0_i32_0 : i32
    scf.if %2 {
      %cst = arith.constant 0.000000e+00 : f32
      %33 = vector.broadcast %cst : f32 to vector<3x8x128xf32>
      %c0_20 = arith.constant 0 : index
      %c0_21 = arith.constant 0 : index
      %c0_22 = arith.constant 0 : index
      %34 = vector.load %arg4[%c0_20, %c0_21, %c0_22] : memref<3x8x128xf32, #tpu.memory_space<vmem>>, vector<3x8x128xf32>
      tpu.vector_store %arg4[%c0_20, %c0_21, %c0_22], %33 {strides = array<i32>} : memref<3x8x128xf32, #tpu.memory_space<vmem>>, vector<3x8x128xf32>,
    } else {
    }
    %c0 = arith.constant 0 : index
    %c0_1 = arith.constant 0 : index
    %c0_2 = arith.constant 0 : index
    %3 = vector.load %arg4[%c0, %c0_1, %c0_2] : memref<3x8x128xf32, #tpu.memory_space<vmem>>, vector<1x8x128xf32>
    %4 = vector.shape_cast %3 : vector<1x8x128xf32> to vector<8x128xf32>
    %c1 = arith.constant 1 : index
    %c0_3 = arith.constant 0 : index
    %c0_4 = arith.constant 0 : index
    %5 = vector.load %arg4[%c1, %c0_3, %c0_4] : memref<3x8x128xf32, #tpu.memory_space<vmem>>, vector<1x8x128xf32>
    %6 = vector.shape_cast %5 : vector<1x8x128xf32> to vector<8x128xf32>
    %c2 = arith.constant 2 : index
    %c0_5 = arith.constant 0 : index
    %c0_6 = arith.constant 0 : index
    %7 = vector.load %arg4[%c2, %c0_5, %c0_6] : memref<3x8x128xf32, #tpu.memory_space<vmem>>, vector<1x8x128xf32>
    %8 = vector.shape_cast %7 : vector<1x8x128xf32> to vector<8x128xf32>
    %c0_i32_7 = arith.constant 0 : i32
    %c8_i32 = arith.constant 8 : i32
    %9 = arith.muli %c0_i32_7, %c8_i32 : i32
    %10 = tpu.assume_multiple %9, 8 : i32
    %11 = arith.index_cast %10 : i32 to index
    %c0_8 = arith.constant 0 : index
    %12 = vector.load %arg1[%11, %c0_8] : memref<8x128xf32, #tpu.memory_space<vmem>>, vector<8x128xf32>
    %13 = arith.index_cast %10 : i32 to index
    %c0_9 = arith.constant 0 : index
    %14 = vector.load %arg2[%13, %c0_9] : memref<8x128xf32, #tpu.memory_space<vmem>>, vector<8x128xf32>
    %15 = arith.mulf %12, %12 : vector<8x128xf32>
    %16 = arith.addf %4, %15 : vector<8x128xf32>
    %17 = arith.mulf %14, %14 : vector<8x128xf32>
    %18 = arith.addf %6, %17 : vector<8x128xf32>
    %19 = arith.mulf %12, %14 : vector<8x128xf32>
    %20 = arith.addf %8, %19 : vector<8x128xf32>
    %c1_i32 = arith.constant 1 : i32
    %c0_10 = arith.constant 0 : index
    %c0_11 = arith.constant 0 : index
    %c0_12 = arith.constant 0 : index
    %21 = vector.load %arg4[%c0_10, %c0_11, %c0_12] : memref<3x8x128xf32, #tpu.memory_space<vmem>>, vector<1x8x128xf32>
    %22 = vector.shape_cast %21 : vector<1x8x128xf32> to vector<8x128xf32>
    %23 = vector.shape_cast %16 : vector<8x128xf32> to vector<1x8x128xf32>
    tpu.vector_store %arg4[%c0_10, %c0_11, %c0_12], %23 {strides = array<i32>} : memref<3x8x128xf32, #tpu.memory_space<vmem>>, vector<1x8x128xf32>,
    %c1_13 = arith.constant 1 : index
    %c0_14 = arith.constant 0 : index
    %c0_15 = arith.constant 0 : index
    %24 = vector.load %arg4[%c1_13, %c0_14, %c0_15] : memref<3x8x128xf32, #tpu.memory_space<vmem>>, vector<1x8x128xf32>
    %25 = vector.shape_cast %24 : vector<1x8x128xf32> to vector<8x128xf32>
    %26 = vector.shape_cast %18 : vector<8x128xf32> to vector<1x8x128xf32>
    tpu.vector_store %arg4[%c1_13, %c0_14, %c0_15], %26 {strides = array<i32>} : memref<3x8x128xf32, #tpu.memory_space<vmem>>, vector<1x8x128xf32>,
    %c2_16 = arith.constant 2 : index
    %c0_17 = arith.constant 0 : index
    %c0_18 = arith.constant 0 : index
    %27 = vector.load %arg4[%c2_16, %c0_17, %c0_18] : memref<3x8x128xf32, #tpu.memory_space<vmem>>, vector<1x8x128xf32>
    %28 = vector.shape_cast %27 : vector<1x8x128xf32> to vector<8x128xf32>
    %29 = vector.shape_cast %20 : vector<8x128xf32> to vector<1x8x128xf32>
    tpu.vector_store %arg4[%c2_16, %c0_17, %c0_18], %29 {strides = array<i32>} : memref<3x8x128xf32, #tpu.memory_space<vmem>>, vector<1x8x128xf32>,
    %c3_i32 = arith.constant 3 : i32
    %30 = arith.cmpi eq, %arg0, %c3_i32 : i32
    %31 = arith.extui %30 : i1 to i32
    %c0_i32_19 = arith.constant 0 : i32
    %32 = arith.cmpi ne, %31, %c0_i32_19 : i32
    scf.if %32 {
      %c0_20 = arith.constant 0 : index
      %c0_21 = arith.constant 0 : index
      %c0_22 = arith.constant 0 : index
      %33 = vector.load %arg4[%c0_20, %c0_21, %c0_22] : memref<3x8x128xf32, #tpu.memory_space<vmem>>, vector<1x8x128xf32>
      %34 = vector.shape_cast %33 : vector<1x8x128xf32> to vector<8x128xf32>
      %35 = vector.shape_cast %34 : vector<8x128xf32> to vector<1x8x128xf32>
      %cst = arith.constant dense<0.000000e+00> : vector<1xf32>
      %36 = vector.multi_reduction <add>, %35, %cst [1, 2] : vector<1x8x128xf32> to vector<1xf32>
      %37 = vector.shape_cast %36 : vector<1xf32> to vector<1x1x1xf32>
      %38 = vector.extract %37[0, 0, 0] : f32 from vector<1x1x1xf32>
      %c1_23 = arith.constant 1 : index
      %c0_24 = arith.constant 0 : index
      %c0_25 = arith.constant 0 : index
      %39 = vector.load %arg4[%c1_23, %c0_24, %c0_25] : memref<3x8x128xf32, #tpu.memory_space<vmem>>, vector<1x8x128xf32>
      %40 = vector.shape_cast %39 : vector<1x8x128xf32> to vector<8x128xf32>
      %41 = vector.shape_cast %40 : vector<8x128xf32> to vector<1x8x128xf32>
      %cst_26 = arith.constant dense<0.000000e+00> : vector<1xf32>
      %42 = vector.multi_reduction <add>, %41, %cst_26 [1, 2] : vector<1x8x128xf32> to vector<1xf32>
      %43 = vector.shape_cast %42 : vector<1xf32> to vector<1x1x1xf32>
      %44 = vector.extract %43[0, 0, 0] : f32 from vector<1x1x1xf32>
      %c2_27 = arith.constant 2 : index
      %c0_28 = arith.constant 0 : index
      %c0_29 = arith.constant 0 : index
      %45 = vector.load %arg4[%c2_27, %c0_28, %c0_29] : memref<3x8x128xf32, #tpu.memory_space<vmem>>, vector<1x8x128xf32>
      %46 = vector.shape_cast %45 : vector<1x8x128xf32> to vector<8x128xf32>
      %47 = vector.shape_cast %46 : vector<8x128xf32> to vector<1x8x128xf32>
      %cst_30 = arith.constant dense<0.000000e+00> : vector<1xf32>
      %48 = vector.multi_reduction <add>, %47, %cst_30 [1, 2] : vector<1x8x128xf32> to vector<1xf32>
      %49 = vector.shape_cast %48 : vector<1xf32> to vector<1x1x1xf32>
      %50 = vector.extract %49[0, 0, 0] : f32 from vector<1x1x1xf32>
      %cst_31 = arith.constant 2.000000e+00 : f32
      %51 = arith.mulf %cst_31, %50 : f32
      %52 = arith.mulf %38, %44 : f32
      %53 = math.rsqrt %52 : f32
      %54 = arith.mulf %51, %53 : f32
      %cst_32 = arith.constant 2.000000e+00 : f32
      %55 = arith.addf %cst_32, %54 : f32
      %c0_33 = arith.constant 0 : index
      %c0_34 = arith.constant 0 : index
      %56 = memref.load %arg3[%c0_33, %c0_34] : memref<1x1xf32, #tpu.memory_space<smem>>
      memref.store %55, %arg3[%c0_33, %c0_34] : memref<1x1xf32, #tpu.memory_space<smem>>
    } else {
    }
    return
  }
  func.func @transform_0(%arg0: i32) -> (i32, i32) {
    %c0_i32 = arith.constant 0 : i32
    %c0_i32_0 = arith.constant 0 : i32
    return %arg0, %c0_i32 : i32, i32
  }
  func.func @transform_1(%arg0: i32) -> (i32, i32) {
    %c0_i32 = arith.constant 0 : i32
    %c0_i32_0 = arith.constant 0 : i32
    return %arg0, %c0_i32 : i32, i32
  }
  func.func @transform_2(%arg0: i32) -> (i32, i32) {
    %c0_i32 = arith.constant 0 : i32
    %c0_i32_0 = arith.constant 0 : i32
    %c0_i32_1 = arith.constant 0 : i32
    return %c0_i32, %c0_i32_0 : i32, i32
  }
}

</mosaic_0001>

<bundles_post_ra>
// kernel: tpu_custom_call.1
= control target key start
LH: loop header
LB: loop body
LE: loop exit
PB: predicated region body
PF: predicated region fallthrough
CT: control target
= control target key end

     0   :  { %7 = vsyncpa [#allocation4], 0  ;;  %s684_s0 = inlined_call_operand.hbm [shape: f32[32,128], index: 0, kind: input, shape index: {}]   ;;  %s685_s1 = inlined_call_operand.hbm [shape: f32[32,128], index: 1, kind: input, shape index: {}]   ;;  %s686_s2 = inlined_call_operand.hbm [shape: f32[1,1], index: 2, kind: output, shape index: {}]  }
   0x1   :  { %9 = vsyncpa [#allocation4 + $0x1], 0 }
   0x2   :  { %10 = vsyncpa [#allocation7], 0 }
   0x3   :  { %12 = vsyncpa [#allocation7 + $0x1], 0 }
   0x4   :  { %13 = vsyncpa [#allocation5], 0  ;;  %s557_s9 = smov 0   ;;  %s559_s10 = smov 0  }
   0x5   :  { %s561_s11 = smov 0   ;;  %s563_s12 = smov 0  }
   0x6 LB: > { %s576_s13 = sadd.s32 4294967295, %s538_s12   ;;  %s579_s14 = sadd.s32 1, %s538_s12   ;;  %s538_s12 = sphi %s563_s12, %s694_s12   ;;  %s534_s11 = sphi %s561_s11, %s693_s11   ;;  %s530_s10 = sphi %s559_s10, %s692_s10   ;;  %s526_s9 = sphi %s557_s9, %s691_s9  }
   0x7   : > { %s23_s15 = ssub.s32 %s538_s12, %s579_s14  ;;  %s26_s16 = sadd.s32 1, %s534_s11 }
   0x8   : > { %p24_p0 = scmp.eq.s32.totalorder %s23_s15, 0  ;;  %p33_p1 = scmp.ne.s32.totalorder %s534_s11, %s530_s10 }
   0x9   : > { %p34_p2 = scmp.eq.s32.totalorder %s538_s12, 0  ;;  %p39_p3 = scmp.ne.s32.totalorder %s530_s10, %s526_s9 }
   0xa   : > { %s589_s17 = scalar_select %p24_p0, %s534_s11, %s26_s16  }
   0xb   : > { %p591_p4 = por %p34_p2, %p33_p1  ;;  %p40_p5 = scmp.eq.s32.totalorder %s576_s13, 0 }
   0xc   : > { %p383_p6 = scmp.lt.s32.totalorder %s538_s12, 4  ;;  %s602_s20 = sand.u32 1, %s534_s11  }
   0xd   : > { %p597_p7 = por %p40_p5, %p39_p3  ;;  %s347_s21 = sshll.u32 %s602_s20, 3 }
   0xe   : > { %s348_s22 = sshll.u32 %s538_s12, 3  ;;  %s114_s26 = scalar_lea.vmem [#allocation3], %s347_s21 }
   0xf   : > { %s118_s25 = scalar_lea.hbm %s684_s0, %s348_s22  ;;  %s122_s27 = sshll.u32 %s114_s26, 4  ;;  %s123_s27 = int_to_ptr.vmem [resolvable:$true] %s122_s27 }
  0x10   : > { %s120_s28 = sshll.u32 %s118_s25, 4  ;;  %p611_p8 = pnand %p383_p6, %p591_p4  ;;  %s121_s28 = int_to_ptr.hbm [resolvable:$true] %s120_s28 }
  0x11   : > { %p351_p9 = scmp.ge.s32.totalorder %s538_s12, 1  ;;  %p146_p10 = scmp.lt.s32.totalorder %s538_s12, 5 }
  0x12   : > { %s111_s30 = scalar_lea.sflag [#allocation4], %s602_s20  ;;  %s422_s3 = sshra.s32 %s121_s28, 4  ;;  %s423_s3 = int_to_ptr.hbm [resolvable:$true] %s422_s3 }
  0x13   : > { %s424_s4 = scalar_lea.hbm %s423_s3, 8  ;;  %p426_p12 = pneg %p611_p8 }
  0x14   : > { %p425_p11 = scmp.ne.s32.totalorder %s423_s3, %s424_s4  ;;  %s429_s7 = scalar_lea.hbm %s684_s0, 32 }
  0x15   : > { %p430_p1 = scmp.lt.s32.totalorder %s423_s3, %s684_s0  ;;  %p431_p2 = scmp.lt.s32.totalorder %s429_s7, %s424_s4 }
  0x16   : > { %p427_p13 = pnand %p426_p12, %p425_p11 }
  0x17   : > { %p432_p3 = por %p431_p2, %p430_p1 }
  0x18   : > { %p428_p0 = pneg %p427_p13 }
  0x1a   : > { %p433_p4 = pnand %p432_p3, %p428_p0 }
  0x1c   : > { %436 = shalt.err (!%p433_p4)
}
  0x1d   : > { %379 = dma.hbm_to_vmem [thread:$0]  (!%p611_p8), %s121_s28, 128, %s123_s27, %s111_s30  }
  0x1e   : > { %p635_p5 = pnand %p351_p9, %p146_p10  ;;  %s137_s23 = scalar_lea.hbm %s685_s1, %s348_s22 }
  0x1f   : > { %s133_s24 = scalar_lea.vmem [#allocation6], %s347_s21  ;;  %s139_s26 = sshll.u32 %s137_s23, 4  ;;  %s140_s26 = int_to_ptr.hbm [resolvable:$true] %s139_s26 }
  0x20   : > { %s141_s25 = sshll.u32 %s133_s24, 4  ;;  %s130_s3 = scalar_lea.sflag [#allocation7], %s602_s20  ;;  %s142_s25 = int_to_ptr.vmem [resolvable:$true] %s141_s25 }
  0x21   : > { %s452_s4 = sshra.s32 %s140_s26, 4  ;;  %s459_s28 = scalar_lea.hbm %s685_s1, 32  ;;  %s453_s4 = int_to_ptr.hbm [resolvable:$true] %s452_s4 }
  0x22   : > { %s454_s5 = scalar_lea.hbm %s453_s4, 8  ;;  %p460_p11 = scmp.lt.s32.totalorder %s453_s4, %s685_s1 }
  0x23   : > { %p455_p6 = scmp.ne.s32.totalorder %s453_s4, %s454_s5  ;;  %p461_p13 = scmp.lt.s32.totalorder %s459_s28, %s454_s5 }
  0x25   : > { %p457_p9 = pnand %p455_p6, %p426_p12  ;;  %p462_p0 = por %p461_p13, %p460_p11 }
  0x27   : > { %p458_p10 = pneg %p457_p9 }
  0x29   : > { %p463_p1 = pnand %p462_p0, %p458_p10 }
  0x2b   : > { %466 = shalt.err (!%p463_p1)
}
  0x2c   : > { %382 = dma.hbm_to_vmem [thread:$0]  (!%p611_p8), %s140_s26, 128, %s142_s25, %s130_s3  }
  0x2d   : > { %150 = sbr.rel (%p635_p5) target bundleno = 347 (0x15b), region = 28  ;;  %s152_s20 = sand.u32 (!%p635_p5), 1, %s530_s10  }
  0x2e   : > { %s352_s21 = sshll.u32 (!%p635_p5), %s152_s20, 3  ;;  %s153_s6 = scalar_lea.sflag (!%p635_p5), [#allocation4], %s152_s20 }
  0x2f   : > { %s156_s7 = scalar_lea.vmem (!%p635_p5), [#allocation3], %s352_s21 }
  0x32   : > { %513 = dma.done.wait (%p597_p7), %s153_s6, 128  }
  0x33   : > { %515 = vsyncadd (%p597_p7), %s153_s6, 4294967168  ;;  %s163_s8 = scalar_lea.sflag [#allocation7], %s152_s20  ;;  %s166_s9 = scalar_lea.vmem [#allocation6], %s352_s21 }
  0x34   : > { %517 = dma.done.wait (%p597_p7), %s163_s8, 128  }
  0x35   : > { %519 = vsyncadd (%p597_p7), %s163_s8, 4294967168  ;;  %p354_p8 = scmp.ne.s32.totalorder %s576_s13, 0 }
  0x37   : > { %191 = sbr.rel (%p354_p8) target bundleno = 64 (0x40), region = 40 }
  0x3c   : > { %v540_v0 = vmov 0.0  }
  0x3d   : > { %192 = vst [vmem:[#allocation2 + $0x10] sm:$0xff] %v540_v0 }
  0x3e   : > { %193 = vst [vmem:[#allocation2] sm:$0xff] %v540_v0 }
  0x3f   : > { %194 = vst [vmem:[#allocation2 + $0x8] sm:$0xff] %v540_v0 }
  0x40 PF: > { %v200_v2 = vld [vmem:[%s156_s7] sm:$0xff]  ;;  %v201_v5 = vld [vmem:[%s166_s9] sm:$0xff]  ;;  %p355_p7 = scmp.ne.s32.totalorder %s576_s13, 3 }
  0x41   : > { %v202_v3 = vmul.f32 %v200_v2, %v200_v2  ;;  %v204_v7 = vmul.f32 %v201_v5, %v201_v5  ;;  %v206_v8 = vmul.f32 %v201_v5, %v200_v2 }
  0x44   : > { %v195_v1 = vld [vmem:[#allocation2 + $0x10] sm:$0xff] }
  0x45   : > { %v197_v4 = vld [vmem:[#allocation2] sm:$0xff]  ;;  %v203_v9 = vadd.f32 %v202_v3, %v195_v1  ;;  %214 = sbr.rel (%p355_p7) target bundleno = 341 (0x155), region = 44 }
  0x46   : > { %v199_v6 = vld [vmem:[#allocation2 + $0x8] sm:$0xff]  ;;  %v205_v10 = vadd.f32 %v204_v7, %v197_v4 }
  0x47   : > { %v207_v11 = vadd.f32 %v206_v8, %v199_v6  ;;  %208 = vst [vmem:[#allocation2 + $0x10] sm:$0xff] %v203_v9 }
  0x48   : > { %209 = vst [vmem:[#allocation2] sm:$0xff] %v205_v10 }
  0x49   : > { %210 = vst [vmem:[#allocation2 + $0x8] sm:$0xff] %v207_v11 }
  0x4e   : > { %v215_v12 = vld [vmem:[#allocation2 + $0x10] sm:$0xff] }
  0x4f   : > { %216 = vadd.xlane.f32.xlu0 %v215_v12  ;;  %v225_v14 = vld [vmem:[#allocation2] sm:$0xff] }
  0x50   : > { %v235_v13 = vld [vmem:[#allocation2 + $0x8] sm:$0xff] }
  0x51   : > { %236 = vadd.xlane.f32.xlu1 %v235_v13 }
  0x57   : > { %226 = vadd.xlane.f32.xlu0 %v225_v14 }
  0xc2   : > { %v217_v15 = vpop.xlane.xlu0 %216 }
  0xc3   : > { %v218_v16 = vrot.slane %v217_v15, 4 }
  0xc4   : > { %v237_v29 = vpop.xlane.xlu1 %236 }
  0xc5   : > { %v219_v17 = vadd.f32 %v218_v16, %v217_v15  ;;  %v238_v30 = vrot.slane %v237_v29, 4 }
  0xc7   : > { %v220_v18 = vrot.slane %v219_v17, 2  ;;  %v239_v31 = vadd.f32 %v238_v30, %v237_v29 }
  0xc9   : > { %v221_v19 = vadd.f32 %v220_v18, %v219_v17  ;;  %v240_v32 = vrot.slane %v239_v31, 2 }
  0xca   : > { %v227_v20 = vpop.xlane.xlu0 %226 }
  0xcb   : > { %v228_v21 = vrot.slane %v227_v20, 4  ;;  %v222_v22 = vrot.slane %v221_v19, 1  ;;  %v241_v33 = vadd.f32 %v240_v32, %v239_v31 }
  0xcd   : > { %v229_v23 = vadd.f32 %v228_v21, %v227_v20  ;;  %v223_v24 = vadd.f32 %v222_v22, %v221_v19  ;;  %v242_v34 = vrot.slane %v241_v33, 1 }
  0xcf   : > { %v230_v25 = vrot.slane %v229_v23, 2  ;;  %360 = vpush %v223_v24  ;;  %v243_v35 = vadd.f32 %v242_v34, %v241_v33 }
  0xd1   : > { %v231_v26 = vadd.f32 %v230_v25, %v229_v23 }
  0xd3   : > { %v232_v27 = vrot.slane %v231_v26, 1 }
  0xd5   : > { %v233_v28 = vadd.f32 %v232_v27, %v231_v26 }
  0xd7   : > { %362 = vpush %v233_v28 }
  0xd8   : > { %364 = vpush %v243_v35 }
 0x100   : > { %s361_s19 = spop %360 }
 0x108   : > { %s363_s29 = spop %362 }
 0x109   : > { %s246_s15 = smul.f32 %s363_s29, %s361_s19  ;;  %s365_s16 = spop %364 }
 0x10a   : > { %s245_s18 = smul.f32 2.0, %s365_s16 }
 0x10b   : > { %v247_v36 = vstv %s246_s15 }
 0x10c   : > { %420 = vrsqrt.f32 %v247_v36  ;;  %vm254_vm1 = vweird.f32 %v247_v36 }
 0x112   : > { %v421_v37 = vpop.eup %420 }
 0x113   : > { %v249_v38 = vmul.f32 %v421_v37, %v247_v36  ;;  %vm255_vm0 = vweird.f32 %v421_v37 }
 0x114   : > { %vm256_vm2 = vmor %vm254_vm1, %vm255_vm0 }
 0x115   : > { %v250_v39 = vmul.f32 %v421_v37, %v249_v38 }
 0x117   : > { %v251_v40 = vmul.f32 0.5, %v250_v39 }
 0x119   : > { %v252_v41 = vsub.f32 1.5, %v251_v40 }
 0x11b   : > { %v253_v42 = vmul.f32 %v421_v37, %v252_v41 }
 0x11d   : > { %v257_v43 = vsel %vm256_vm2, %v421_v37, %v253_v42 }
 0x11e   : > { %366 = vpush %v257_v43 }
 0x14f   : > { %s367_s23 = spop %366 }
 0x150   : > { %s259_s24 = smul.f32 %s367_s23, %s245_s18 }
 0x152   : > { %s260_s25 = sadd.f32 2.0, %s259_s24 }
 0x154   : > { %262 = sst [smem:[#allocation8]] %s260_s25 }
 0x155 PF: > { %p384_p12 = scmp.eq.s32.totalorder %s576_s13, 3  ;;  %s269_s4 = sshll.u32 %s686_s2, 4  ;;  %s270_s4 = int_to_ptr.hbm [resolvable:$true] %s269_s4 }
 0x156   : > { %s541_s5 = smov [#allocation8]  }
 0x157   : > { %373 = dma.smem_to_hbm (%p384_p12), %s541_s5, 16, %s270_s4, [#allocation5]  }
 0x158   : > { %521 = dma.done.wait (%p384_p12), [#allocation5], 16  }
 0x159   : > { %523 = vsyncadd (%p384_p12), [#allocation5], 4294967280 }
 0x15a   : > { %278 = sfence }
 0x15b PF: > { %p16_p2 = scmp.ge.s32.totalorder %s579_s14, 6   ;;  %s691_s9 = smov %s530_s10 }
 0x15c   : > { %s692_s10 = smov %s534_s11  ;;  %s693_s11 = smov %s589_s17 }
 0x15d   : > { %s694_s12 = smov %s579_s14  ;;  %18 = sbr.rel (!%p16_p2) target bundleno = 6 (0x6), region = 89 }
 0x162   :  { %284 = vsyncpa [#allocation4], 1 }
 0x163   :  { %286 = vsyncpa [#allocation4 + $0x1], 1 }
 0x164   :  { %287 = vsyncpa [#allocation7], 1 }
 0x165   :  { %289 = vsyncpa [#allocation7 + $0x1], 1 }
 0x166   :  { %290 = vsyncpa [#allocation5], 1 }
 0x167   :  { %292 = vsyncpa [#allocation5 + $0x1], 1 }

</bundles_post_ra>
